<compile_context>
chip_gen: v5e
topology: v5e:2x2
jax: 0.10.0
libtpu: 0.0.40
codegen_flags: <defaults>
</compile_context>

<pallas_src>
import functools

import jax
import jax.numpy as jnp
from jax.experimental import pallas as pl
from jax.experimental.pallas import tpu as pltpu

_LANE = 128


# ---------------------------------------------------------------------------
# Kernel
# ---------------------------------------------------------------------------

def _multi_head_kernel(x_ref, w_ref, b_ref, o_ref, *, num_heads, d_out, combine):
    """(tile_n, D_in)bf16 @ (D_in, C)bf16 -> f32, + bias, optional head-max.

    combine == 'linear': C is either H*D_out (concat, weights pre-interleaved so
    the matmul output IS the concat layout) or D_out (sum/mean, weights
    pre-reduced on the host).  combine == 'max': C == H*D_out and the running
    maximum over the H static column slices is written (shape (tile_n, D_out)).
    """
    y = jnp.dot(x_ref[...], w_ref[...], preferred_element_type=jnp.float32)
    y = y + b_ref[...].astype(jnp.float32)          # (1, C) broadcasts over rows
    if combine == "max":
        acc = y[:, 0:d_out]
        for h in range(1, num_heads):               # static, H is small
            acc = jnp.maximum(acc, y[:, h * d_out:(h + 1) * d_out])
        o_ref[...] = acc.astype(o_ref.dtype)
    else:
        o_ref[...] = y.astype(o_ref.dtype)


# ---------------------------------------------------------------------------
# Tiling / VMEM planning
# ---------------------------------------------------------------------------

def _round_up(a, m):
    return ((a + m - 1) // m) * m


def _vmem_budget_bytes():
    """Generation-aware scoped-VMEM budget (leaves headroom for internals)."""
    cap = 128 * 1024 * 1024
    try:
        cap = int(pltpu.get_tpu_info().vmem_capacity_bytes)
    except Exception:
        pass
    if cap <= 64 * 1024 * 1024:          # v7x-class TensorCore (64 MiB)
        return 40 * 1024 * 1024
    return 56 * 1024 * 1024              # v5e / v6e (128 MiB physical)


def _plan_tiles(n, d_in, cols, out_cols, *, is_max, budget):
    """Pick (tile_n, tile_c) against the VMEM byte budget."""
    bytes_x, bytes_w, bytes_o = 2, 2, 4              # bf16 X/W, f32 out
    w_stream_budget = 8 * 1024 * 1024

    # Column tiling only for the pure-linear readouts; 'max' needs every head's
    # columns resident for the in-register reduction.
    if is_max or d_in * cols * bytes_w <= w_stream_budget:
        tile_c = cols
    else:
        tile_c = max(2 * _LANE,
                     (w_stream_budget // (d_in * bytes_w)) // (2 * _LANE) * (2 * _LANE))
        tile_c = min(tile_c, _round_up(cols, _LANE))

    single_buffer_w = tile_c >= cols                 # constant index -> fetch once
    resident = d_in * tile_c * bytes_w * (1 if single_buffer_w else 2) + tile_c * 4 * 2

    out_tile_c = out_cols if is_max else tile_c
    per_row = (d_in * bytes_x * 2                    # double-buffered X tile
               + out_tile_c * bytes_o * 2            # double-buffered output tile
               + (cols * 4 if is_max else 0))        # f32 pre-max intermediate

    avail = budget - 6 * 1024 * 1024 - resident
    tile_n_max = max(8, avail // per_row)

    if tile_n_max >= n:
        tile_n = n
    elif tile_n_max >= _LANE:
        tile_n = (tile_n_max // _LANE) * _LANE
    else:
        tile_n = max(8, (tile_n_max // 8) * 8)

    # Keep >=2 N steps when possible: shards the parallel axis over v7x's two
    # TensorCores and lets the pipeline overlap DMA with compute everywhere.
    if n >= 2 * _LANE:
        tile_n = min(tile_n, _round_up(pl.cdiv(n, 2), _LANE))

    return tile_n, tile_c, pl.cdiv(n, tile_n), pl.cdiv(cols, tile_c), single_buffer_w


# ---------------------------------------------------------------------------
# Host-side param fusion (call once per weight update, not per forward)
# ---------------------------------------------------------------------------

def make_fused_params(w, b, readout, *, param_dtype=jnp.bfloat16):
    """w: (H, D_in, D_out), b: (H, D_out) -> fused (D_in, C)/(1, C)."""
    num_heads, d_in, d_out = w.shape
    if readout in ("concat", "max"):
        # Column block h*D_out+j == W_h[:, j] -> matmul output is the concat layout.
        w_f = jnp.transpose(w, (1, 0, 2)).reshape(d_in, num_heads * d_out)
        b_f = b.reshape(1, num_heads * d_out)
    elif readout == "sum":
        w_f, b_f = jnp.sum(w, axis=0), jnp.sum(b, axis=0)[None, :]
    elif readout == "mean":
        w_f, b_f = jnp.mean(w, axis=0), jnp.mean(b, axis=0)[None, :]
    else:
        raise ValueError("Unknown readout type")
    return w_f.astype(param_dtype), b_f.astype(jnp.float32)


# ---------------------------------------------------------------------------
# Forward
# ---------------------------------------------------------------------------

def multi_head_forward(x, w_fused, b_fused, readout, *, num_heads, d_out,
                       out_dtype=jnp.float32):
    """x: (N, D_in) bf16/f32, w_fused: (D_in, C) bf16, b_fused: (1, C) f32."""
    n, d_in = x.shape
    cols = w_fused.shape[1]
    is_max = readout == "max"
    out_cols = d_out if is_max else cols

    budget = _vmem_budget_bytes()
    tile_n, tile_c, n_tiles, c_tiles, single_buf = _plan_tiles(
        n, d_in, cols, out_cols, is_max=is_max, budget=budget)

    kernel = functools.partial(
        _multi_head_kernel, num_heads=num_heads, d_out=d_out,
        combine="max" if is_max else "linear")

    if is_max:
        out_spec = pl.BlockSpec((tile_n, out_cols), lambda c, i: (i, 0))
    else:
        out_spec = pl.BlockSpec((tile_n, tile_c), lambda c, i: (i, c))

    def build(w_mode):
        def wspec(shape, imap):
            if w_mode is None:
                return pl.BlockSpec(shape, imap)
            return pl.BlockSpec(shape, imap, pipeline_mode=w_mode)

        return pl.pallas_call(
            kernel,
            out_shape=jax.ShapeDtypeStruct((n, out_cols), out_dtype),
            grid_spec=pltpu.PrefetchScalarGridSpec(
                num_scalar_prefetch=0,
                grid=(c_tiles, n_tiles),                           # N axis innermost
                in_specs=[
                    pl.BlockSpec((tile_n, d_in), lambda c, i: (i, 0)),   # X tile
                    wspec((d_in, tile_c), lambda c, i: (0, c)),          # fused W
                    wspec((1, tile_c), lambda c, i: (0, c)),             # fused b
                ],
                out_specs=out_spec,
            ),
            compiler_params=pltpu.CompilerParams(
                dimension_semantics=("parallel", "parallel"),
                vmem_limit_bytes=budget,
            ),
        )

    # Single-buffer the constant-index weights/bias when they span the whole
    # column range; fall back to default double-buffering if rejected.
    modes = (pl.Buffered(1), None) if (single_buf and c_tiles == 1) else (None,)
    err = None
    for mode in modes:
        try:
            return build(mode)(x, w_fused, b_fused)
        except Exception as e:
            err = e
    raise err


def multi_head_wrapper(x, w, b, readout, *, out_dtype=jnp.float32):
    """x: (N, D_in) f32, w: (H, D_in, D_out) f32, b: (H, D_out) f32.

    NOTE: in a real model, make_fused_params should be hoisted and run once per
    weight update; it is inlined here so the script is self-contained.
    """
    num_heads, _, d_out = w.shape
    w_f, b_f = make_fused_params(w, b, readout)
    x_bf = x if x.dtype == jnp.bfloat16 else x.astype(jnp.bfloat16)
    return multi_head_forward(x_bf, w_f, b_f, readout,
                              num_heads=num_heads, d_out=d_out,
                              out_dtype=out_dtype)


# ---------------------------------------------------------------------------
# Pure-JAX reference (mirrors the PyTorch forward, same bf16-cast operands)
# ---------------------------------------------------------------------------

def _reference(x, w, b, readout):
    xr = x.astype(jnp.bfloat16).astype(jnp.float32)
    wr = w.astype(jnp.bfloat16).astype(jnp.float32)
    outs = jnp.einsum("nd,hde->hne", xr, wr) + b[:, None, :]   # (H, N, D_out)
    if readout == "concat":
        return jnp.transpose(outs, (1, 0, 2)).reshape(x.shape[0], -1)
    if readout == "mean":
        return outs.mean(axis=0)
    if readout == "max":
        return outs.max(axis=0)
    if readout == "sum":
        return outs.sum(axis=0)
    raise ValueError("Unknown readout type")


if __name__ == "__main__":
    key = jax.random.PRNGKey(0)
    ok = True

    # (N, D_in, D_out): tiny single-block, exact 2-tile, and ragged-N cases.
    for (N, D_in, D_out) in ((16, 32, 16), (256, 128, 128), (300, 128, 64)):
        num_heads = 4
        key, kx, kw, kb = jax.random.split(key, 4)
        x = jax.random.normal(kx, (N, D_in), dtype=jnp.float32)
        w = jax.random.normal(kw, (num_heads, D_in, D_out), dtype=jnp.float32) * 0.1
        b = jax.random.normal(kb, (num_heads, D_out), dtype=jnp.float32) * 0.1

        for readout in ("concat", "mean", "max", "sum"):
            out = jax.block_until_ready(multi_head_wrapper(x, w, b, readout))
            ref = _reference(x, w, b, readout)
            if not jnp.allclose(out, ref, atol=2e-2, rtol=2e-2):
                ok = False
                err = float(jnp.max(jnp.abs(out - ref)))
                print(f"MISMATCH readout={readout} shapes=({N},{D_in},{D_out}) "
                      f"max_err={err}")

    if ok:
        print("KERNEL_OK")
</pallas_src>

<mosaic_0001>
module attributes {stable_mosaic.version = 11 : i64} {
  func.func @_multi_head_kernel(%arg0: i32, %arg1: i32, %arg2: memref<16x32xbf16, #tpu.memory_space<vmem>>, %arg3: memref<32x64xbf16, #tpu.memory_space<vmem>>, %arg4: memref<1x64xf32, #tpu.memory_space<vmem>>, %arg5: memref<16x64xf32, #tpu.memory_space<vmem>>) attributes {dimension_semantics = [#tpu.dimension_semantics<parallel>, #tpu.dimension_semantics<parallel>], iteration_bounds = array<i64: 1, 1>, scalar_prefetch = 0 : i64, scratch_operands = 0 : i64, tpu.core_type = #tpu.core_type<tc>, window_params = [{transform_indices = @transform_0, window_bounds = array<i64: 16, 32>}, {pipeline_mode = #tpu.pipeline_mode<synchronous>, transform_indices = @transform_1, window_bounds = array<i64: 32, 64>}, {pipeline_mode = #tpu.pipeline_mode<synchronous>, transform_indices = @transform_2, window_bounds = array<i64: 1, 64>}, {transform_indices = @transform_3, window_bounds = array<i64: 16, 64>}]} {
    %c0 = arith.constant 0 : index
    %c0_0 = arith.constant 0 : index
    %0 = vector.load %arg2[%c0, %c0_0] : memref<16x32xbf16, #tpu.memory_space<vmem>>, vector<16x32xbf16>
    %c0_1 = arith.constant 0 : index
    %c0_2 = arith.constant 0 : index
    %1 = vector.load %arg3[%c0_1, %c0_2] : memref<32x64xbf16, #tpu.memory_space<vmem>>, vector<32x64xbf16>
    %cst = arith.constant dense<0.000000e+00> : vector<16x64xf32>
    %2 = tpu.matmul %0, %1, %cst {dimension_numbers = #tpu.dot_dimension_numbers<[1], [0], [0], [1], [0, 0, 1, 1], [], []>} : vector<16x32xbf16>, vector<32x64xbf16>, vector<16x64xf32> -> vector<16x64xf32>
    %c0_3 = arith.constant 0 : index
    %c0_4 = arith.constant 0 : index
    %3 = vector.load %arg4[%c0_3, %c0_4] : memref<1x64xf32, #tpu.memory_space<vmem>>, vector<1x64xf32>
    %4 = vector.broadcast %3 : vector<1x64xf32> to vector<16x64xf32>
    %5 = arith.addf %2, %4 : vector<16x64xf32>
    %c0_5 = arith.constant 0 : index
    %c0_6 = arith.constant 0 : index
    %6 = vector.load %arg5[%c0_5, %c0_6] : memref<16x64xf32, #tpu.memory_space<vmem>>, vector<16x64xf32>
    tpu.vector_store %arg5[%c0_5, %c0_6], %5 {strides = array<i32>} : memref<16x64xf32, #tpu.memory_space<vmem>>, vector<16x64xf32>,
    return
  }
  func.func @transform_0(%arg0: i32, %arg1: i32) -> (i32, i32) {
    %c0_i32 = arith.constant 0 : i32
    %c0_i32_0 = arith.constant 0 : i32
    return %arg1, %c0_i32 : i32, i32
  }
  func.func @transform_1(%arg0: i32, %arg1: i32) -> (i32, i32) {
    %c0_i32 = arith.constant 0 : i32
    %c0_i32_0 = arith.constant 0 : i32
    return %c0_i32, %arg0 : i32, i32
  }
  func.func @transform_2(%arg0: i32, %arg1: i32) -> (i32, i32) {
    %c0_i32 = arith.constant 0 : i32
    %c0_i32_0 = arith.constant 0 : i32
    return %c0_i32, %arg0 : i32, i32
  }
  func.func @transform_3(%arg0: i32, %arg1: i32) -> (i32, i32) {
    %c0_i32 = arith.constant 0 : i32
    return %arg1, %arg0 : i32, i32
  }
}

module attributes {stable_mosaic.version = 11 : i64} {
  func.func @_multi_head_kernel(%arg0: i32, %arg1: i32, %arg2: memref<16x32xbf16, #tpu.memory_space<vmem>>, %arg3: memref<32x64xbf16, #tpu.memory_space<vmem>>, %arg4: memref<1x64xf32, #tpu.memory_space<vmem>>, %arg5: memref<16x64xf32, #tpu.memory_space<vmem>>) attributes {dimension_semantics = [#tpu.dimension_semantics<parallel>, #tpu.dimension_semantics<parallel>], iteration_bounds = array<i64: 1, 1>, scalar_prefetch = 0 : i64, scratch_operands = 0 : i64, tpu.core_type = #tpu.core_type<tc>, window_params = [{transform_indices = @transform_0, window_bounds = array<i64: 16, 32>}, {transform_indices = @transform_1, window_bounds = array<i64: 32, 64>}, {transform_indices = @transform_2, window_bounds = array<i64: 1, 64>}, {transform_indices = @transform_3, window_bounds = array<i64: 16, 64>}]} {
    %c0 = arith.constant 0 : index
    %c0_0 = arith.constant 0 : index
    %0 = vector.load %arg2[%c0, %c0_0] : memref<16x32xbf16, #tpu.memory_space<vmem>>, vector<16x32xbf16>
    %c0_1 = arith.constant 0 : index
    %c0_2 = arith.constant 0 : index
    %1 = vector.load %arg3[%c0_1, %c0_2] : memref<32x64xbf16, #tpu.memory_space<vmem>>, vector<32x64xbf16>
    %cst = arith.constant dense<0.000000e+00> : vector<16x64xf32>
    %2 = tpu.matmul %0, %1, %cst {dimension_numbers = #tpu.dot_dimension_numbers<[1], [0], [0], [1], [0, 0, 1, 1], [], []>} : vector<16x32xbf16>, vector<32x64xbf16>, vector<16x64xf32> -> vector<16x64xf32>
    %c0_3 = arith.constant 0 : index
    %c0_4 = arith.constant 0 : index
    %3 = vector.load %arg4[%c0_3, %c0_4] : memref<1x64xf32, #tpu.memory_space<vmem>>, vector<1x64xf32>
    %4 = vector.broadcast %3 : vector<1x64xf32> to vector<16x64xf32>
    %5 = arith.addf %2, %4 : vector<16x64xf32>
    %c0_5 = arith.constant 0 : index
    %c0_6 = arith.constant 0 : index
    %6 = vector.load %arg5[%c0_5, %c0_6] : memref<16x64xf32, #tpu.memory_space<vmem>>, vector<16x64xf32>
    tpu.vector_store %arg5[%c0_5, %c0_6], %5 {strides = array<i32>} : memref<16x64xf32, #tpu.memory_space<vmem>>, vector<16x64xf32>,
    return
  }
  func.func @transform_0(%arg0: i32, %arg1: i32) -> (i32, i32) {
    %c0_i32 = arith.constant 0 : i32
    %c0_i32_0 = arith.constant 0 : i32
    return %arg1, %c0_i32 : i32, i32
  }
  func.func @transform_1(%arg0: i32, %arg1: i32) -> (i32, i32) {
    %c0_i32 = arith.constant 0 : i32
    %c0_i32_0 = arith.constant 0 : i32
    return %c0_i32, %arg0 : i32, i32
  }
  func.func @transform_2(%arg0: i32, %arg1: i32) -> (i32, i32) {
    %c0_i32 = arith.constant 0 : i32
    %c0_i32_0 = arith.constant 0 : i32
    return %c0_i32, %arg0 : i32, i32
  }
  func.func @transform_3(%arg0: i32, %arg1: i32) -> (i32, i32) {
    %c0_i32 = arith.constant 0 : i32
    return %arg1, %arg0 : i32, i32
  }
}

</mosaic_0001>

<bundles_post_ra>
// kernel: tpu_custom_call.1
= control target key start
LH: loop header
LB: loop body
LE: loop exit
PB: predicated region body
PF: predicated region fallthrough
CT: control target
= control target key end

     0   :  { %8 = vsyncpa [#allocation3], 0  ;;  %s257_s0 = inlined_call_operand.hbm [shape: bf16[16,32], index: 0, kind: input, shape index: {}]   ;;  %s258_s1 = inlined_call_operand.hbm [shape: bf16[32,64], index: 1, kind: input, shape index: {}]   ;;  %s259_s2 = inlined_call_operand.vmem [shape: f32[1,64], index: 2, kind: input, shape index: {}]   ;;  %s260_s3 = inlined_call_operand.hbm [shape: f32[16,64], index: 3, kind: output, shape index: {}]  }
   0x1   :  { %9 = vsyncpa [#allocation6], 0 }
   0x2   :  { %10 = vsyncpa [#allocation4], 0  ;;  %s15_s14 = sshll.u32 %s257_s0, 4  ;;  %s218_s15 = smov [#allocation2]   ;;  %s16_s14 = int_to_ptr.hbm [resolvable:$true] %s15_s14 }
   0x3   :  { %s17_s16 = sshll.u32 %s218_s15, 4  ;;  %s28_s19 = sshll.u32 %s258_s1, 4  ;;  %s18_s16 = int_to_ptr.vmem [resolvable:$true] %s17_s16  ;;  %s29_s19 = int_to_ptr.hbm [resolvable:$true] %s28_s19 }
   0x4   :  { %s219_s20 = smov 64   ;;  %s220_s21 = smov 4  }
   0x5   :  { %23 = dma.hbm_to_vmem [thread:$0]  %s16_s14, 128, %s18_s16, [#allocation3], %s219_s20, %s219_s20, %s220_s21  }
   0x6   :  { %s221_s22 = smov [#allocation5]  }
   0x7   :  { %s30_s23 = sshll.u32 %s221_s22, 4  ;;  %s31_s23 = int_to_ptr.vmem [resolvable:$true] %s30_s23 }
   0x8   :  { %36 = dma.hbm_to_vmem [thread:$0]  %s29_s19, 256, %s31_s23, [#allocation6], %s219_s20, %s219_s20, %s220_s21  }
   0x9   :  { %212 = dma.done.wait [#allocation3], 128  }
   0xa   :  { %213 = vsyncadd [#allocation3], 4294967168 }
   0xb   :  { %214 = dma.done.wait [#allocation6], 256  }
   0xc   :  { %215 = vsyncadd [#allocation6], 4294967040  ;;  %v131_v0 = vld [vmem:[#allocation5 + $0x8] sm:$0xff]  ;;  %v130_v1 = vld [vmem:[#allocation5] sm:$0xff]  ;;  %vm75_vm0 = vcmask 261120   ;;  %vm93_vm1 = vcmask 523264  }
   0xd   :  { %85 = vmatpush.bf16.msra.mxu0 %v131_v0  ;;  %v129_v2 = vld [vmem:[#allocation2] sm:$0xff]  ;;  %s222_s24 = smov [#allocation7]   ;;  %s102_s28 = sshll.u32 %s260_s3, 4  ;;  %s103_s28 = int_to_ptr.hbm [resolvable:$true] %s102_s28 }
   0xe   :  { %v139_v3 = vld [vmem:[%s259_s2] ss:$0 sm:$0xff]  ;;  %s100_s25 = sshll.u32 %s222_s24, 4  ;;  %s223_s29 = smov 128   ;;  %s101_s25 = int_to_ptr.vmem [resolvable:$true] %s100_s25 }
   0xf   :  { %s224_s30 = smov 8  }
  0x11   :  { %86 = vmatpush.bf16.msra.mxu0 %v130_v1 }
  0x14   :  { %128 = vmatmul.msk.bf16.vlgmr.msra.gmra.mxu0 %vm75_vm0, %v129_v2 }
  0x91   :  { %v88_v4 = vpop.f32.mrf.mxu0 }
  0x92   :  { %v89_v5 = vadd.f32 %v139_v3, %v88_v4 }
  0x94   :  { %94 = vst.msk [vmem:[#allocation7] sm:$0xff] %vm93_vm1, %v89_v5 }
  0x99   :  { %v90_v6 = vpop.f32.mrf.mxu0 }
  0x9a   :  { %v91_v7 = vadd.f32 %v139_v3, %v90_v6 }
  0x9c   :  { %95 = vst.msk [vmem:[#allocation7 + $0x8] sm:$0xff] %vm93_vm1, %v91_v7 }
  0x9d   :  { %108 = dma.vmem_to_hbm [thread:$0]  %s101_s25, 256, %s103_s28, [#allocation4], %s223_s29, %s223_s29, %s224_s30  }
  0x9e   :  { %216 = dma.done.wait [#allocation4], 256  }
  0x9f   :  { %217 = vsyncadd [#allocation4], 4294967040 }
  0xa0   :  { %113 = vsyncpa [#allocation3], 1 }
  0xa1   :  { %114 = vsyncpa [#allocation6], 1 }
  0xa2   :  { %115 = vsyncpa [#allocation4], 1 }

// kernel: tpu_custom_call.1
= control target key start
LH: loop header
LB: loop body
LE: loop exit
PB: predicated region body
PF: predicated region fallthrough
CT: control target
= control target key end

     0   :  { %8 = vsyncpa [#allocation3], 0  ;;  %s257_s0 = inlined_call_operand.hbm [shape: bf16[16,32], index: 0, kind: input, shape index: {}]   ;;  %s258_s1 = inlined_call_operand.hbm [shape: bf16[32,64], index: 1, kind: input, shape index: {}]   ;;  %s259_s2 = inlined_call_operand.vmem [shape: f32[1,64], index: 2, kind: input, shape index: {}]   ;;  %s260_s3 = inlined_call_operand.hbm [shape: f32[16,64], index: 3, kind: output, shape index: {}]  }
   0x1   :  { %9 = vsyncpa [#allocation6], 0 }
   0x2   :  { %10 = vsyncpa [#allocation4], 0  ;;  %s15_s14 = sshll.u32 %s257_s0, 4  ;;  %s218_s15 = smov [#allocation2]   ;;  %s16_s14 = int_to_ptr.hbm [resolvable:$true] %s15_s14 }
   0x3   :  { %s17_s16 = sshll.u32 %s218_s15, 4  ;;  %s28_s19 = sshll.u32 %s258_s1, 4  ;;  %s18_s16 = int_to_ptr.vmem [resolvable:$true] %s17_s16  ;;  %s29_s19 = int_to_ptr.hbm [resolvable:$true] %s28_s19 }
   0x4   :  { %s219_s20 = smov 64   ;;  %s220_s21 = smov 4  }
   0x5   :  { %23 = dma.hbm_to_vmem [thread:$0]  %s16_s14, 128, %s18_s16, [#allocation3], %s219_s20, %s219_s20, %s220_s21  }
   0x6   :  { %s221_s22 = smov [#allocation5]  }
   0x7   :  { %s30_s23 = sshll.u32 %s221_s22, 4  ;;  %s31_s23 = int_to_ptr.vmem [resolvable:$true] %s30_s23 }
   0x8   :  { %36 = dma.hbm_to_vmem [thread:$0]  %s29_s19, 256, %s31_s23, [#allocation6], %s219_s20, %s219_s20, %s220_s21  }
   0x9   :  { %212 = dma.done.wait [#allocation3], 128  }
   0xa   :  { %213 = vsyncadd [#allocation3], 4294967168 }
   0xb   :  { %214 = dma.done.wait [#allocation6], 256  }
   0xc   :  { %215 = vsyncadd [#allocation6], 4294967040  ;;  %v131_v0 = vld [vmem:[#allocation5 + $0x8] sm:$0xff]  ;;  %v130_v1 = vld [vmem:[#allocation5] sm:$0xff]  ;;  %vm75_vm0 = vcmask 261120   ;;  %vm93_vm1 = vcmask 523264  }
   0xd   :  { %85 = vmatpush.bf16.msra.mxu0 %v131_v0  ;;  %v129_v2 = vld [vmem:[#allocation2] sm:$0xff]  ;;  %s222_s24 = smov [#allocation7]   ;;  %s102_s28 = sshll.u32 %s260_s3, 4  ;;  %s103_s28 = int_to_ptr.hbm [resolvable:$true] %s102_s28 }
   0xe   :  { %v139_v3 = vld [vmem:[%s259_s2] ss:$0 sm:$0xff]  ;;  %s100_s25 = sshll.u32 %s222_s24, 4  ;;  %s223_s29 = smov 128   ;;  %s101_s25 = int_to_ptr.vmem [resolvable:$true] %s100_s25 }
   0xf   :  { %s224_s30 = smov 8  }
  0x11   :  { %86 = vmatpush.bf16.msra.mxu0 %v130_v1 }
  0x14   :  { %128 = vmatmul.msk.bf16.vlgmr.msra.gmra.mxu0 %vm75_vm0, %v129_v2 }
  0x91   :  { %v88_v4 = vpop.f32.mrf.mxu0 }
  0x92   :  { %v89_v5 = vadd.f32 %v139_v3, %v88_v4 }
  0x94   :  { %94 = vst.msk [vmem:[#allocation7] sm:$0xff] %vm93_vm1, %v89_v5 }
  0x99   :  { %v90_v6 = vpop.f32.mrf.mxu0 }
  0x9a   :  { %v91_v7 = vadd.f32 %v139_v3, %v90_v6 }
  0x9c   :  { %95 = vst.msk [vmem:[#allocation7 + $0x8] sm:$0xff] %vm93_vm1, %v91_v7 }
  0x9d   :  { %108 = dma.vmem_to_hbm [thread:$0]  %s101_s25, 256, %s103_s28, [#allocation4], %s223_s29, %s223_s29, %s224_s30  }
  0x9e   :  { %216 = dma.done.wait [#allocation4], 256  }
  0x9f   :  { %217 = vsyncadd [#allocation4], 4294967040 }
  0xa0   :  { %113 = vsyncpa [#allocation3], 1 }
  0xa1   :  { %114 = vsyncpa [#allocation6], 1 }
  0xa2   :  { %115 = vsyncpa [#allocation4], 1 }

</bundles_post_ra>
